<compile_context>
chip_gen: v7x
topology: tpu7x:2x2x1
jax: 0.10.0
libtpu: 0.0.40
codegen_flags: <defaults>
</compile_context>

<pallas_src>
import functools

import jax
import jax.numpy as jnp
from jax.experimental import pallas as pl
from jax.experimental.pallas import tpu as pltpu


# ---------------------------------------------------------------------------
# Kernels (elementwise hot path)
# ---------------------------------------------------------------------------
def _transform_kernel(w_ref, x1_ref, x2_ref, o1_ref, o2_ref):
    # w_ref: SMEM (4,) float32 = [w0, w1, 1/w0, 1/w1]
    w0 = w_ref[0]
    w1 = w_ref[1]
    x1 = x1_ref[...]
    x2 = x2_ref[...]
    o1_ref[...] = (w0 * x1 + w1 * x2).astype(o1_ref.dtype)
    o2_ref[...] = (w1 * x1 + w0 * x2).astype(o2_ref.dtype)


def _reverse_kernel(w_ref, x1_ref, x2_ref, o1_ref, o2_ref):
    # Matches the PyTorch reference `reverse` (not the true inverse of
    # `transform`).  Uses precomputed scalar reciprocals: multiply-only work.
    w0 = w_ref[0]
    w1 = w_ref[1]
    inv_w0 = w_ref[2]
    inv_w1 = w_ref[3]
    x1 = x1_ref[...]
    x2 = x2_ref[...]
    o1_ref[...] = ((x1 - w1 * x2) * inv_w0).astype(o1_ref.dtype)
    o2_ref[...] = ((x2 - w0 * x1) * inv_w1).astype(o2_ref.dtype)


# ---------------------------------------------------------------------------
# Tiling helpers
# ---------------------------------------------------------------------------
_LANE_CANDIDATES = (2048, 1024, 512, 256, 128)  # lane-dense slab widths
_FALLBACK_LANE_W = 512                          # used only on the pad path


@functools.lru_cache(maxsize=None)
def _hw_tiling():
    """Generation-aware (tile_bytes_per_array, vmem_limit_bytes)."""
    tile_bytes = 4 * 1024 * 1024      # safe default everywhere
    vmem_limit = 48 * 1024 * 1024
    try:
        vmem = int(pltpu.get_tpu_info().vmem_capacity_bytes)
        if vmem >= 96 * 1024 * 1024:
            # v5e / v6e: 128 MiB physical VMEM -> bigger tiles, higher limit.
            tile_bytes = 6 * 1024 * 1024
            vmem_limit = 96 * 1024 * 1024
        else:
            # v7x: 64 MiB physical VMEM per TC.
            # 4 tiled arrays x 2 buffers x 4 MiB = 32 MiB resident < 48 MiB.
            tile_bytes = 4 * 1024 * 1024
            vmem_limit = 48 * 1024 * 1024
    except Exception:
        pass
    return tile_bytes, vmem_limit


# ---------------------------------------------------------------------------
# Module-equivalent wrapper
# ---------------------------------------------------------------------------
class WeightedImageEmbedding:
    def __init__(self, channels, width, height):
        self.channels = channels
        self.width = width
        self.height = height
        # deterministic parameter init, matching torch.tensor([0.9, 0.1])
        self.weights = jnp.array([0.9, 0.1], dtype=jnp.float32)
        # Softmax over 2 weights + exact reciprocals, hoisted out of the
        # per-call path (tiny glue, computed once).
        sm = jax.nn.softmax(self.weights, axis=0).astype(jnp.float32)
        self._wvec = jnp.concatenate([sm, 1.0 / sm]).astype(jnp.float32)  # (4,)

    def _run(self, image1, image2, kernel):
        assert image1.shape == image2.shape, "Input images must have the same size"
        b, c, h, w = image1.shape
        dtype = image1.dtype
        itemsize = jnp.dtype(dtype).itemsize
        n = b * c * h * w

        tile_bytes, vmem_limit = _hw_tiling()

        # ---- lane-dense slab layout (no pad in the common case) ----------
        lane_w = None
        for lw in _LANE_CANDIDATES:
            if n % lw == 0:
                lane_w = lw
                break

        padded = lane_w is None
        if padded:
            # Rare fallback: n has no factor that is a multiple of 128.
            lane_w = _FALLBACK_LANE_W
            n_slab = pl.cdiv(n, lane_w) * lane_w
            x1 = jnp.pad(image1.reshape(-1), (0, n_slab - n)).reshape(-1, lane_w)
            x2 = jnp.pad(image2.reshape(-1), (0, n_slab - n)).reshape(-1, lane_w)
        else:
            x1 = image1.reshape(-1, lane_w)
            x2 = image2.reshape(-1, lane_w)

        rows_total = x1.shape[0]

        # ---- row tile: multiple of sublane pack; ragged last block OK ----
        sub = max(8, 32 // itemsize)          # 8 rows f32, 16 bf16, 32 i8
        if rows_total <= sub:
            tr = rows_total                   # single full-dims block
        else:
            target_rows = max(sub, (tile_bytes // (lane_w * itemsize)) // sub * sub)
            # Cap so the grid has >= ~4 steps when possible: keeps DMA/compute
            # double-buffering alive and lets v7x shard tiles on both TCs.
            cap = max(sub, (rows_total // 4) // sub * sub)
            tr = min(target_rows, cap)
        grid = (pl.cdiv(rows_total, tr),)

        def tile_spec():
            return pl.BlockSpec((tr, lane_w), lambda i: (i, 0))

        out_shape = (
            jax.ShapeDtypeStruct((rows_total, lane_w), dtype),
            jax.ShapeDtypeStruct((rows_total, lane_w), dtype),
        )

        y1, y2 = pl.pallas_call(
            kernel,
            out_shape=out_shape,
            grid=grid,
            in_specs=[
                pl.BlockSpec(memory_space=pltpu.SMEM),  # weights (4,)
                tile_spec(),                            # image1 slab
                tile_spec(),                            # image2 slab
            ],
            out_specs=(
                tile_spec(),
                tile_spec(),
            ),
            compiler_params=pltpu.CompilerParams(
                dimension_semantics=("parallel",),       # shard tiles on v7x's 2 TCs
                vmem_limit_bytes=vmem_limit,
            ),
            cost_estimate=pl.CostEstimate(
                flops=6 * n,
                transcendentals=0,
                bytes_accessed=4 * n * itemsize,         # 2 reads + 2 writes
            ),
        )(self._wvec, x1, x2)

        if padded:
            y1 = y1.reshape(-1)[:n]
            y2 = y2.reshape(-1)[:n]
        return y1.reshape(b, c, h, w), y2.reshape(b, c, h, w)

    def __call__(self, image1, image2, rev=False):
        if not rev:
            return self._run(image1, image2, _transform_kernel)
        else:
            return self._run(image1, image2, _reverse_kernel)


# ---------------------------------------------------------------------------
# Pure-JAX reference for correctness checking
# ---------------------------------------------------------------------------
def _ref_transform(w, x1, x2):
    sm = jax.nn.softmax(w, axis=0)
    return sm[0] * x1 + sm[1] * x2, sm[1] * x1 + sm[0] * x2


def _ref_reverse(w, x1, x2):
    sm = jax.nn.softmax(w, axis=0)
    return (x1 - sm[1] * x2) / sm[0], (x2 - sm[0] * x1) / sm[1]


def _check(mod, image1, image2, atol, rtol):
    m1, m2 = mod(image1, image2, rev=False)
    jax.block_until_ready((m1, m2))
    r1, r2 = _ref_transform(mod.weights, image1, image2)
    assert m1.shape == image1.shape and m2.shape == image2.shape
    assert jnp.allclose(m1, r1, atol=atol, rtol=rtol)
    assert jnp.allclose(m2, r2, atol=atol, rtol=rtol)

    o1, o2 = mod(image1, image2, rev=True)
    jax.block_until_ready((o1, o2))
    q1, q2 = _ref_reverse(mod.weights, image1, image2)
    assert jnp.allclose(o1, q1, atol=10 * atol, rtol=10 * rtol)
    assert jnp.allclose(o2, q2, atol=10 * atol, rtol=10 * rtol)


if __name__ == "__main__":
    key = jax.random.PRNGKey(0)
    k1, k2, k3, k4, k5, k6 = jax.random.split(key, 6)

    # Primary small test: exact lane-dense slab (no padding path).
    B, C, H, W = 2, 4, 16, 16
    mod = WeightedImageEmbedding(channels=C, width=W, height=H)
    i1 = jax.random.normal(k1, (B, C, H, W), dtype=jnp.float32)
    i2 = jax.random.normal(k2, (B, C, H, W), dtype=jnp.float32)
    _check(mod, i1, i2, atol=1e-5, rtol=1e-5)

    # Multi-tile grid with a ragged last block (no padding path).
    B2, C2, H2, W2 = 4, 8, 32, 36
    mod2 = WeightedImageEmbedding(channels=C2, width=W2, height=H2)
    j1 = jax.random.normal(k3, (B2, C2, H2, W2), dtype=jnp.float32)
    j2 = jax.random.normal(k4, (B2, C2, H2, W2), dtype=jnp.float32)
    _check(mod2, j1, j2, atol=1e-5, rtol=1e-5)

    # Odd element count: exercises the rare pad/slice fallback path.
    B3, C3, H3, W3 = 2, 3, 15, 17
    mod3 = WeightedImageEmbedding(channels=C3, width=W3, height=H3)
    p1 = jax.random.normal(k5, (B3, C3, H3, W3), dtype=jnp.float32)
    p2 = jax.random.normal(k6, (B3, C3, H3, W3), dtype=jnp.float32)
    _check(mod3, p1, p2, atol=1e-5, rtol=1e-5)

    print("KERNEL_OK")
</pallas_src>

<mosaic_0001>
module attributes {stable_mosaic.version = 11 : i64} {
  func.func @_transform_kernel(%arg0: i32, %arg1: memref<4xf32, #tpu.memory_space<smem>>, %arg2: memref<1x2048xf32, #tpu.memory_space<vmem>>, %arg3: memref<1x2048xf32, #tpu.memory_space<vmem>>, %arg4: memref<1x2048xf32, #tpu.memory_space<vmem>>, %arg5: memref<1x2048xf32, #tpu.memory_space<vmem>>) attributes {dimension_semantics = [#tpu.dimension_semantics<parallel>], iteration_bounds = array<i64: 1>, scalar_prefetch = 0 : i64, scratch_operands = 0 : i64, tpu.core_type = #tpu.core_type<tc>, window_params = [{transform_indices = @transform_0, window_bounds = array<i64: 4>}, {transform_indices = @transform_1, window_bounds = array<i64: 1, 2048>}, {transform_indices = @transform_2, window_bounds = array<i64: 1, 2048>}, {transform_indices = @transform_3, window_bounds = array<i64: 1, 2048>}, {transform_indices = @transform_4, window_bounds = array<i64: 1, 2048>}]} {
    %c0 = arith.constant 0 : index
    %0 = memref.load %arg1[%c0] : memref<4xf32, #tpu.memory_space<smem>>
    %c1 = arith.constant 1 : index
    %1 = memref.load %arg1[%c1] : memref<4xf32, #tpu.memory_space<smem>>
    %c0_0 = arith.constant 0 : index
    %c0_1 = arith.constant 0 : index
    %2 = vector.load %arg2[%c0_0, %c0_1] : memref<1x2048xf32, #tpu.memory_space<vmem>>, vector<1x2048xf32>
    %c0_2 = arith.constant 0 : index
    %c0_3 = arith.constant 0 : index
    %3 = vector.load %arg3[%c0_2, %c0_3] : memref<1x2048xf32, #tpu.memory_space<vmem>>, vector<1x2048xf32>
    %4 = vector.broadcast %0 : f32 to vector<1x2048xf32>
    %5 = arith.mulf %4, %2 : vector<1x2048xf32>
    %6 = vector.broadcast %1 : f32 to vector<1x2048xf32>
    %7 = arith.mulf %6, %3 : vector<1x2048xf32>
    %8 = arith.addf %5, %7 : vector<1x2048xf32>
    %c0_4 = arith.constant 0 : index
    %c0_5 = arith.constant 0 : index
    %9 = vector.load %arg4[%c0_4, %c0_5] : memref<1x2048xf32, #tpu.memory_space<vmem>>, vector<1x2048xf32>
    tpu.vector_store %arg4[%c0_4, %c0_5], %8 {strides = array<i32>} : memref<1x2048xf32, #tpu.memory_space<vmem>>, vector<1x2048xf32>,
    %10 = vector.broadcast %1 : f32 to vector<1x2048xf32>
    %11 = arith.mulf %10, %2 : vector<1x2048xf32>
    %12 = vector.broadcast %0 : f32 to vector<1x2048xf32>
    %13 = arith.mulf %12, %3 : vector<1x2048xf32>
    %14 = arith.addf %11, %13 : vector<1x2048xf32>
    %c0_6 = arith.constant 0 : index
    %c0_7 = arith.constant 0 : index
    %15 = vector.load %arg5[%c0_6, %c0_7] : memref<1x2048xf32, #tpu.memory_space<vmem>>, vector<1x2048xf32>
    tpu.vector_store %arg5[%c0_6, %c0_7], %14 {strides = array<i32>} : memref<1x2048xf32, #tpu.memory_space<vmem>>, vector<1x2048xf32>,
    return
  }
  func.func @transform_0(%arg0: i32) -> i32 {
    %c0_i32 = arith.constant 0 : i32
    %c0_i32_0 = arith.constant 0 : i32
    return %c0_i32 : i32
  }
  func.func @transform_1(%arg0: i32) -> (i32, i32) {
    %c0_i32 = arith.constant 0 : i32
    %c0_i32_0 = arith.constant 0 : i32
    return %arg0, %c0_i32 : i32, i32
  }
  func.func @transform_2(%arg0: i32) -> (i32, i32) {
    %c0_i32 = arith.constant 0 : i32
    %c0_i32_0 = arith.constant 0 : i32
    return %arg0, %c0_i32 : i32, i32
  }
  func.func @transform_3(%arg0: i32) -> (i32, i32) {
    %c0_i32 = arith.constant 0 : i32
    %c0_i32_0 = arith.constant 0 : i32
    return %arg0, %c0_i32 : i32, i32
  }
  func.func @transform_4(%arg0: i32) -> (i32, i32) {
    %c0_i32 = arith.constant 0 : i32
    %c0_i32_0 = arith.constant 0 : i32
    return %arg0, %c0_i32 : i32, i32
  }
}

</mosaic_0001>

<bundles_post_ra>
// kernel: tpu_custom_call.1
= control target key start
LH: loop header
LB: loop body
LE: loop exit
PB: predicated region body
PF: predicated region fallthrough
CT: control target
= control target key end

     0   :  { %10 = vsyncpa [#allocation5], 0  ;;  %s319_s0 = inlined_call_operand.hbm [shape: f32[4], index: 0, kind: input, shape index: {}]   ;;  %s320_s1 = inlined_call_operand.hbm [shape: f32[1,2048], index: 1, kind: input, shape index: {}]   ;;  %s321_s2 = inlined_call_operand.hbm [shape: f32[1,2048], index: 2, kind: input, shape index: {}]   ;;  %s322_s3 = inlined_call_operand.hbm [shape: f32[1,2048], index: 3, kind: output, shape index: {0}]   ;;  %s323_s4 = inlined_call_operand.hbm [shape: f32[1,2048], index: 4, kind: output, shape index: {1}]  }
   0x1   :  { %11 = vsyncpa [#allocation3], 0 }
   0x2   :  { %12 = vsyncpa [#allocation8], 0 }
   0x3   :  { %13 = vsyncpa [#allocation4], 0 }
   0x4   :  { %14 = vsyncpa [#allocation11], 0  ;;  %s114_s17 = scalar_lea.hbm %s319_s0, 16 }
   0x5   :  { %p115_p0 = scmp.ne.s32.totalorder %s319_s0, %s114_s17  ;;  %p118_p1 = scmp.lt.u32.totalorder %s114_s17, %s319_s0 }
   0x7   :  { %p120_p2 = pnand %p118_p1, %p115_p0 }
   0x9   :  { %123 = shalt.err (!%p120_p2)
}
   0xa   :  { %s222_s22 = smov [#allocation2]   ;;  %s223_s25 = smov [#allocation6]  }
   0xb   :  { %22 = dma.hbm_to_smem %s319_s0, 16, %s222_s22, [#allocation5]  }
   0xc   :  { %s29_s26 = sshll.u32 %s223_s25, 4  ;;  %s224_s27 = smov [#allocation7]   ;;  %s30_s26 = int_to_ptr.vmem [resolvable:$true] %s29_s26 }
   0xd   :  { %s39_s28 = sshll.u32 %s224_s27, 4  ;;  %s124_s5 = scalar_lea.hbm %s320_s1, 256  ;;  %s40_s28 = int_to_ptr.vmem [resolvable:$true] %s39_s28 }
   0xe   :  { %p125_p3 = scmp.ne.s32.totalorder %s320_s1, %s124_s5  ;;  %p128_p4 = scmp.lt.u32.totalorder %s124_s5, %s320_s1 }
  0x10   :  { %p130_p5 = pnand %p128_p4, %p125_p3 }
  0x12   :  { %133 = shalt.err (!%p130_p5)
}
  0x13   :  { %s134_s0 = scalar_lea.vmem %s30_s26, 256  ;;  %p139_p7 = scmp.lt.s32.totalorder %s30_s26, %s30_s26 }
  0x14   :  { %p135_p6 = scmp.ne.s32.totalorder %s30_s26, %s134_s0  ;;  %p140_p8 = scmp.lt.s32.totalorder %s134_s0, %s134_s0 }
  0x16   :  { %p141_p9 = por %p140_p8, %p139_p7 }
  0x18   :  { %p142_p10 = pnand %p141_p9, %p135_p6 }
  0x1a   :  { %145 = shalt.err (!%p142_p10)
}
  0x1b   :  { %32 = dma.hbm_to_vmem [thread:$0]  %s320_s1, 256, %s30_s26, [#allocation3]  }
  0x1c   :  { %s146_s14 = scalar_lea.hbm %s321_s2, 256 }
  0x1d   :  { %p147_p11 = scmp.ne.s32.totalorder %s321_s2, %s146_s14  ;;  %p150_p12 = scmp.lt.u32.totalorder %s146_s14, %s321_s2 }
  0x1f   :  { %p152_p13 = pnand %p150_p12, %p147_p11 }
  0x21   :  { %155 = shalt.err (!%p152_p13)
}
  0x22   :  { %s156_s19 = scalar_lea.vmem %s40_s28, 256  ;;  %p161_p1 = scmp.lt.s32.totalorder %s40_s28, %s40_s28 }
  0x23   :  { %p157_p0 = scmp.ne.s32.totalorder %s40_s28, %s156_s19  ;;  %p162_p2 = scmp.lt.s32.totalorder %s156_s19, %s156_s19 }
  0x25   :  { %p163_p3 = por %p162_p2, %p161_p1 }
  0x27   :  { %p164_p4 = pnand %p163_p3, %p157_p0 }
  0x29   :  { %167 = shalt.err (!%p164_p4)
}
  0x2a   :  { %42 = dma.hbm_to_vmem [thread:$0]  %s321_s2, 256, %s40_s28, [#allocation8]  }
  0x2b   :  { %212 = dma.done.wait [#allocation5], 16  }
  0x2c   :  { %213 = vsyncadd [#allocation5], 4294967280 }
  0x2d   :  { %214 = dma.done.wait [#allocation3], 256  }
  0x2e   :  { %215 = vsyncadd [#allocation3], 4294967040 }
  0x2f   :  { %216 = dma.done.wait [#allocation8], 256  }
  0x30   :  { %217 = vsyncadd [#allocation8], 4294967040 }
  0x31   :  { %52 = sfence }
  0x32   :  { %s53_s21 = sld [smem:[#allocation2]]  ;;  %s108_s22 = sld [smem:[#allocation2 + $0x1]]  ;;  %v55_v0 = vld [vmem:[#allocation6] sm:$0xff]  ;;  %v57_v1 = vld [vmem:[#allocation7] sm:$0xff]  ;;  %v56_v2 = vld [vmem:[#allocation6 + $0x8] sm:$0xff] }
  0x33   :  { %v58_v3 = vld [vmem:[#allocation7 + $0x8] sm:$0xff]  ;;  %s225_s23 = smov [#allocation9]   ;;  %s226_s2 = smov [#allocation10]  }
  0x34   :  { %s83_s24 = sshll.u32 %s225_s23, 4  ;;  %s93_s25 = sshll.u32 %s226_s2, 4  ;;  %s84_s24 = int_to_ptr.vmem [resolvable:$true] %s83_s24  ;;  %s288_s25 = int_to_ptr.vmem [resolvable:$true] %s93_s25 }
  0x35   :  { %s168_s26 = scalar_lea.vmem %s84_s24, 256  ;;  %p173_p6 = scmp.lt.s32.totalorder %s84_s24, %s84_s24 }
  0x36   :  { %p169_p5 = scmp.ne.s32.totalorder %s84_s24, %s168_s26  ;;  %p174_p7 = scmp.lt.s32.totalorder %s168_s26, %s168_s26 }
  0x38   :  { %v59_v4 = vstv %s53_s21  ;;  %v62_v5 = vstv %s108_s22  ;;  %p175_p8 = por %p174_p7, %p173_p6 }
  0x39   :  { %v60_v6 = vmul.f32 %v59_v4, %v55_v0  ;;  %v63_v7 = vmul.f32 %v62_v5, %v57_v1  ;;  %v61_v8 = vmul.f32 %v59_v4, %v56_v2  ;;  %v64_v9 = vmul.f32 %v62_v5, %v58_v3 }
  0x3a   :  { %v69_v10 = vmul.f32 %v62_v5, %v55_v0  ;;  %v71_v11 = vmul.f32 %v59_v4, %v57_v1  ;;  %v70_v12 = vmul.f32 %v62_v5, %v56_v2  ;;  %v72_v13 = vmul.f32 %v59_v4, %v58_v3  ;;  %p176_p9 = pnand %p175_p8, %p169_p5 }
  0x3b   :  { %v65_v14 = vadd.f32 %v63_v7, %v60_v6  ;;  %v66_v15 = vadd.f32 %v64_v9, %v61_v8 }
  0x3c   :  { %v73_v16 = vadd.f32 %v71_v11, %v69_v10  ;;  %v74_v17 = vadd.f32 %v72_v13, %v70_v12 }
  0x3d   :  { %67 = vst [vmem:[#allocation9] sm:$0xff] %v65_v14  ;;  %68 = vst [vmem:[#allocation9 + $0x8] sm:$0xff] %v66_v15 }
  0x3e   :  { %75 = vst [vmem:[#allocation10] sm:$0xff] %v73_v16  ;;  %76 = vst [vmem:[#allocation10 + $0x8] sm:$0xff] %v74_v17 }
  0x3f   :  { %179 = shalt.err (!%p176_p9)
}
  0x40   :  { %s180_s29 = scalar_lea.hbm %s322_s3, 256 }
  0x41   :  { %p181_p10 = scmp.ne.s32.totalorder %s322_s3, %s180_s29  ;;  %p184_p11 = scmp.lt.u32.totalorder %s180_s29, %s322_s3 }
  0x43   :  { %p186_p12 = pnand %p184_p11, %p181_p10 }
  0x45   :  { %189 = shalt.err (!%p186_p12)
}
  0x46   :  { %86 = dma.vmem_to_hbm [thread:$0]  %s84_s24, 256, %s322_s3, [#allocation4]  }
  0x47   :  { %s190_s0 = scalar_lea.vmem %s288_s25, 256  ;;  %p195_p0 = scmp.lt.s32.totalorder %s288_s25, %s288_s25 }
  0x48   :  { %p191_p13 = scmp.ne.s32.totalorder %s288_s25, %s190_s0  ;;  %p196_p1 = scmp.lt.s32.totalorder %s190_s0, %s190_s0 }
  0x4a   :  { %p197_p2 = por %p196_p1, %p195_p0 }
  0x4c   :  { %p198_p3 = pnand %p197_p2, %p191_p13 }
  0x4e   :  { %201 = shalt.err (!%p198_p3)
}
  0x4f   :  { %s202_s12 = scalar_lea.hbm %s323_s4, 256 }
  0x50   :  { %p203_p4 = scmp.ne.s32.totalorder %s323_s4, %s202_s12  ;;  %p206_p5 = scmp.lt.u32.totalorder %s202_s12, %s323_s4 }
  0x52   :  { %p208_p6 = pnand %p206_p5, %p203_p4 }
  0x54   :  { %211 = shalt.err (!%p208_p6)
}
  0x55   :  { %96 = dma.vmem_to_hbm [thread:$0]  %s288_s25, 256, %s323_s4, [#allocation11]  }
  0x56   :  { %218 = dma.done.wait [#allocation4], 256  }
  0x57   :  { %219 = vsyncadd [#allocation4], 4294967040 }
  0x58   :  { %220 = dma.done.wait [#allocation11], 256  }
  0x59   :  { %221 = vsyncadd [#allocation11], 4294967040 }
  0x5a   :  { %103 = vsyncpa [#allocation3], 1 }
  0x5b   :  { %104 = vsyncpa [#allocation8], 1 }
  0x5c   :  { %105 = vsyncpa [#allocation4], 1 }
  0x5d   :  { %106 = vsyncpa [#allocation11], 1 }
  0x5e   :  { %107 = vsyncpa [#allocation5], 1 }

</bundles_post_ra>
